<compile_context>
chip_gen: v7x
topology: tpu7x:2x2x1
jax: 0.10.0
libtpu: 0.0.40
codegen_flags: <defaults>
</compile_context>

<pallas_src>
import jax
import jax.numpy as jnp
from jax.experimental import pallas as pl
from jax.experimental.pallas import tpu as pltpu

DEGREE = 10
LANES = 128
SUBLANES = 8


def _round_up(a, b):
    return ((a + b - 1) // b) * b


def _sinpoly_kernel(w_ref, x_ref, o_ref):
    # w_ref: (DEGREE,) scalar-prefetched into SMEM.
    # x_ref/o_ref: (block_rows, 128) VMEM tiles.
    x = x_ref[...].astype(jnp.float32)          # upcast in-VMEM if input is bf16
    w = [w_ref[k] for k in range(DEGREE)]       # hoist SMEM scalar reads
    # Horner without the initial full-vreg broadcast:
    #   acc = x*w[D-1] + w[D-2]; then acc = acc*x + w[k]
    acc = x * w[DEGREE - 1] + w[DEGREE - 2]
    for k in range(DEGREE - 3, -1, -1):
        acc = acc * x + w[k]
    o_ref[...] = acc


def _poly_jnp(x_flat, weights):
    # Tiny (<128 element) ragged-tail path, same Horner scheme in plain jnp.
    x = x_flat.astype(jnp.float32)
    acc = x * weights[DEGREE - 1] + weights[DEGREE - 2]
    for k in range(DEGREE - 3, -1, -1):
        acc = acc * x + weights[k]
    return acc


def _pick_block_rows(rows, tile_rows):
    """Choose the row-block size: big blocks, even & balanced grid split."""
    if rows <= SUBLANES:
        # Single full-array block (block_shape == array shape is always legal).
        return rows, 1
    max_rows = max(SUBLANES, _round_up(tile_rows, SUBLANES))
    steps = pl.cdiv(rows, max_rows)
    # Even number of steps so the ("parallel",) grid splits evenly across
    # v7x's 2 TensorCores; also keeps the per-block sizes nearly equal
    # instead of "one huge block + a sliver remainder".
    if steps % 2 == 1:
        steps += 1
    block_rows = max(SUBLANES, _round_up(pl.cdiv(rows, steps), SUBLANES))
    grid = pl.cdiv(rows, block_rows)
    return block_rows, grid


def _sinpoly_main(x2d, weights_f32, block_rows, grid):
    rows, _ = x2d.shape
    in_itemsize = jnp.dtype(x2d.dtype).itemsize
    cost = pl.CostEstimate(
        flops=2 * (DEGREE - 1) * rows * LANES,            # Horner: mul+add / term
        transcendentals=0,
        bytes_accessed=(in_itemsize + 4) * rows * LANES,  # read x + write y
    )
    return pl.pallas_call(
        _sinpoly_kernel,
        out_shape=jax.ShapeDtypeStruct((rows, LANES), jnp.float32),
        grid_spec=pltpu.PrefetchScalarGridSpec(
            num_scalar_prefetch=1,                        # weights -> SMEM once
            grid=(grid,),
            in_specs=[
                pl.BlockSpec((block_rows, LANES), lambda i, w: (i, 0)),
            ],
            out_specs=pl.BlockSpec((block_rows, LANES), lambda i, w: (i, 0)),
        ),
        compiler_params=pltpu.CompilerParams(
            dimension_semantics=("parallel",),
        ),
        cost_estimate=cost,
    )(weights_f32, x2d)


def sin_poly(x, weights, *, tile_rows=2048):
    """Evaluate the degree-DEGREE polynomial elementwise over flattened x."""
    weights_f32 = weights.astype(jnp.float32)
    x_flat = jnp.ravel(x)                      # no dtype cast: kernel upcasts
    n = x_flat.shape[0]

    n_main = (n // LANES) * LANES              # zero-copy lane-aligned prefix
    if n_main == 0:
        # Entire input is smaller than one lane row; pure-jnp is cheaper than
        # padding up a kernel launch.
        return _poly_jnp(x_flat, weights_f32)

    rows = n_main // LANES
    block_rows, grid = _pick_block_rows(rows, tile_rows)

    x_main = x_flat if n_main == n else x_flat[:n_main]
    out_main = _sinpoly_main(
        x_main.reshape(rows, LANES), weights_f32, block_rows, grid
    ).reshape(-1)

    if n_main == n:
        return out_main                        # aligned: no pad, no slice

    tail = _poly_jnp(x_flat[n_main:], weights_f32)   # < 128 elements
    return jnp.concatenate([out_main, tail])


def sin_poly_ref(x, weights):
    x_flat = jnp.ravel(x).astype(jnp.float32)[:, None]
    exps = jnp.arange(DEGREE, dtype=jnp.float32)
    y = x_flat ** exps
    y = y * weights.astype(jnp.float32)
    return jnp.sum(y, axis=1).reshape(-1)


if __name__ == "__main__":
    key = jax.random.PRNGKey(0)
    wkey, xkey = jax.random.split(key)

    # Deterministic parameter init (stands in for torch.randn(degree)).
    weights = jax.random.normal(wkey, (DEGREE,), dtype=jnp.float32)

    # Case 1: the module's own usage — a 1-D grid of 1000 points
    # (exercises the aligned-prefix kernel path + jnp ragged tail).
    x1 = jnp.linspace(-2 * 3.1416, 2 * 3.1416, 1000, dtype=jnp.float32)
    out1 = jax.block_until_ready(sin_poly(x1, weights))
    ref1 = sin_poly_ref(x1, weights)
    assert out1.shape == (1000,), out1.shape
    assert jnp.allclose(out1, ref1, rtol=1e-4, atol=1e-3), float(
        jnp.max(jnp.abs(out1 - ref1))
    )

    # Case 2: lane-aligned multi-dim input (no-pad, no-slice path; even
    # 2-step parallel grid so both TensorCores get equal work).
    x2 = 0.5 * jax.random.normal(xkey, (2, 4, 16, 16), dtype=jnp.float32)
    out2 = jax.block_until_ready(sin_poly(x2, weights))
    ref2 = sin_poly_ref(x2, weights)
    assert out2.shape == (2 * 4 * 16 * 16,), out2.shape
    assert jnp.allclose(out2, ref2, rtol=1e-4, atol=1e-3), float(
        jnp.max(jnp.abs(out2 - ref2))
    )

    # Case 3: ragged size whose aligned prefix leaves a partial row-block at
    # the grid edge (clipped writeback) plus a jnp tail.
    x3 = jnp.linspace(-1.0, 1.0, 1300, dtype=jnp.float32)
    out3 = jax.block_until_ready(sin_poly(x3, weights))
    ref3 = sin_poly_ref(x3, weights)
    assert out3.shape == (1300,), out3.shape
    assert jnp.allclose(out3, ref3, rtol=1e-4, atol=1e-3), float(
        jnp.max(jnp.abs(out3 - ref3))
    )

    # Case 4: bf16 input streams at half HBM traffic; compute stays f32.
    x4 = (0.5 * jax.random.normal(xkey, (4, 8, 32), dtype=jnp.float32)).astype(
        jnp.bfloat16
    )
    out4 = jax.block_until_ready(sin_poly(x4, weights))
    ref4 = sin_poly_ref(x4.astype(jnp.float32), weights)
    assert out4.shape == (4 * 8 * 32,), out4.shape
    assert out4.dtype == jnp.float32
    assert jnp.allclose(out4, ref4, rtol=1e-2, atol=1e-2), float(
        jnp.max(jnp.abs(out4 - ref4))
    )

    print("KERNEL_OK")
</pallas_src>

<mosaic_0001>
module attributes {stable_mosaic.version = 11 : i64} {
  func.func @_sinpoly_kernel(%arg0: i32, %arg1: memref<10xf32, #tpu.memory_space<smem>>, %arg2: memref<7x128xf32, #tpu.memory_space<vmem>>, %arg3: memref<7x128xf32, #tpu.memory_space<vmem>>) attributes {dimension_semantics = [#tpu.dimension_semantics<parallel>], iteration_bounds = array<i64: 1>, scalar_prefetch = 1 : i64, scratch_operands = 0 : i64, tpu.core_type = #tpu.core_type<tc>, window_params = [{transform_indices = @transform_0, window_bounds = array<i64: 7, 128>}, {transform_indices = @transform_1, window_bounds = array<i64: 7, 128>}]} {
    %c0 = arith.constant 0 : index
    %c0_0 = arith.constant 0 : index
    %0 = vector.load %arg2[%c0, %c0_0] : memref<7x128xf32, #tpu.memory_space<vmem>>, vector<7x128xf32>
    %c0_1 = arith.constant 0 : index
    %1 = memref.load %arg1[%c0_1] : memref<10xf32, #tpu.memory_space<smem>>
    %c1 = arith.constant 1 : index
    %2 = memref.load %arg1[%c1] : memref<10xf32, #tpu.memory_space<smem>>
    %c2 = arith.constant 2 : index
    %3 = memref.load %arg1[%c2] : memref<10xf32, #tpu.memory_space<smem>>
    %c3 = arith.constant 3 : index
    %4 = memref.load %arg1[%c3] : memref<10xf32, #tpu.memory_space<smem>>
    %c4 = arith.constant 4 : index
    %5 = memref.load %arg1[%c4] : memref<10xf32, #tpu.memory_space<smem>>
    %c5 = arith.constant 5 : index
    %6 = memref.load %arg1[%c5] : memref<10xf32, #tpu.memory_space<smem>>
    %c6 = arith.constant 6 : index
    %7 = memref.load %arg1[%c6] : memref<10xf32, #tpu.memory_space<smem>>
    %c7 = arith.constant 7 : index
    %8 = memref.load %arg1[%c7] : memref<10xf32, #tpu.memory_space<smem>>
    %c8 = arith.constant 8 : index
    %9 = memref.load %arg1[%c8] : memref<10xf32, #tpu.memory_space<smem>>
    %c9 = arith.constant 9 : index
    %10 = memref.load %arg1[%c9] : memref<10xf32, #tpu.memory_space<smem>>
    %11 = vector.broadcast %10 : f32 to vector<7x128xf32>
    %12 = arith.mulf %0, %11 : vector<7x128xf32>
    %13 = vector.broadcast %9 : f32 to vector<7x128xf32>
    %14 = arith.addf %12, %13 : vector<7x128xf32>
    %15 = arith.mulf %14, %0 : vector<7x128xf32>
    %16 = vector.broadcast %8 : f32 to vector<7x128xf32>
    %17 = arith.addf %15, %16 : vector<7x128xf32>
    %18 = arith.mulf %17, %0 : vector<7x128xf32>
    %19 = vector.broadcast %7 : f32 to vector<7x128xf32>
    %20 = arith.addf %18, %19 : vector<7x128xf32>
    %21 = arith.mulf %20, %0 : vector<7x128xf32>
    %22 = vector.broadcast %6 : f32 to vector<7x128xf32>
    %23 = arith.addf %21, %22 : vector<7x128xf32>
    %24 = arith.mulf %23, %0 : vector<7x128xf32>
    %25 = vector.broadcast %5 : f32 to vector<7x128xf32>
    %26 = arith.addf %24, %25 : vector<7x128xf32>
    %27 = arith.mulf %26, %0 : vector<7x128xf32>
    %28 = vector.broadcast %4 : f32 to vector<7x128xf32>
    %29 = arith.addf %27, %28 : vector<7x128xf32>
    %30 = arith.mulf %29, %0 : vector<7x128xf32>
    %31 = vector.broadcast %3 : f32 to vector<7x128xf32>
    %32 = arith.addf %30, %31 : vector<7x128xf32>
    %33 = arith.mulf %32, %0 : vector<7x128xf32>
    %34 = vector.broadcast %2 : f32 to vector<7x128xf32>
    %35 = arith.addf %33, %34 : vector<7x128xf32>
    %36 = arith.mulf %35, %0 : vector<7x128xf32>
    %37 = vector.broadcast %1 : f32 to vector<7x128xf32>
    %38 = arith.addf %36, %37 : vector<7x128xf32>
    %c0_2 = arith.constant 0 : index
    %c0_3 = arith.constant 0 : index
    %39 = vector.load %arg3[%c0_2, %c0_3] : memref<7x128xf32, #tpu.memory_space<vmem>>, vector<7x128xf32>
    tpu.vector_store %arg3[%c0_2, %c0_3], %38 {strides = array<i32>} : memref<7x128xf32, #tpu.memory_space<vmem>>, vector<7x128xf32>,
    return
  }
  func.func @transform_0(%arg0: i32, %arg1: memref<10xf32, #tpu.memory_space<smem>>) -> (i32, i32) {
    %c0_i32 = arith.constant 0 : i32
    %c0_i32_0 = arith.constant 0 : i32
    return %arg0, %c0_i32 : i32, i32
  }
  func.func @transform_1(%arg0: i32, %arg1: memref<10xf32, #tpu.memory_space<smem>>) -> (i32, i32) {
    %c0_i32 = arith.constant 0 : i32
    %c0_i32_0 = arith.constant 0 : i32
    return %arg0, %c0_i32 : i32, i32
  }
}

</mosaic_0001>

<bundles_post_ra>
// kernel: tpu_custom_call.1
= control target key start
LH: loop header
LB: loop body
LE: loop exit
PB: predicated region body
PF: predicated region fallthrough
CT: control target
= control target key end

     0   :  { %s207_s0 = inlined_call_operand.hbm [shape: f32[10], index: 0, kind: input, shape index: {}]   ;;  %s208_s1 = inlined_call_operand.hbm [shape: f32[7,128], index: 1, kind: input, shape index: {}]   ;;  %s209_s2 = inlined_call_operand.hbm [shape: f32[7,128], index: 2, kind: output, shape index: {}]  }
   0x1   :  { %s93_s11 = scalar_lea.hbm %s207_s0, 16 }
   0x2   :  { %p94_p0 = scmp.ne.s32.totalorder %s207_s0, %s93_s11  ;;  %p97_p1 = scmp.lt.u32.totalorder %s93_s11, %s207_s0 }
   0x4   :  { %p99_p2 = pnand %p97_p1, %p94_p0 }
   0x6   :  { %102 = shalt.err (!%p99_p2)  }
   0x7   :  { %s153_s16 = smov [#allocation3]  }
   0x8   :  { %8 = dma.hbm_to_smem %s207_s0, 16, %s153_s16, [#allocation2] }
   0x9   :  { %147 = dma.done.wait [#allocation2], 16 }
   0xa   :  { %148 = vsyncadd [#allocation2], 4294967280 }
   0xb   :  { %10 = sfence }
   0xc   :  { %11 = vsyncpa [#allocation5], 0 }
   0xd   :  { %12 = vsyncpa [#allocation6], 0  ;;  %s154_s19 = smov [#allocation4]   ;;  %s103_s23 = scalar_lea.hbm %s208_s1, 128 }
   0xe   :  { %s19_s20 = sshll.u32 %s154_s19, 4  ;;  %p104_p3 = scmp.ne.s32.totalorder %s208_s1, %s103_s23  ;;  %s20_s20 = int_to_ptr.vmem [resolvable:$true] %s19_s20 }
   0xf   :  { %p107_p4 = scmp.lt.u32.totalorder %s103_s23, %s208_s1 }
  0x11   :  { %p109_p5 = pnand %p107_p4, %p104_p3 }
  0x13   :  { %112 = shalt.err (!%p109_p5)
}
  0x14   :  { %s113_s0 = scalar_lea.vmem %s20_s20, 128  ;;  %p118_p7 = scmp.lt.s32.totalorder %s20_s20, %s20_s20 }
  0x15   :  { %p114_p6 = scmp.ne.s32.totalorder %s20_s20, %s113_s0  ;;  %p119_p8 = scmp.lt.s32.totalorder %s113_s0, %s113_s0 }
  0x17   :  { %p120_p9 = por %p119_p8, %p118_p7 }
  0x19   :  { %p121_p10 = pnand %p120_p9, %p114_p6 }
  0x1b   :  { %124 = shalt.err (!%p121_p10)
}
  0x1c   :  { %22 = dma.hbm_to_vmem [thread:$0]  %s208_s1, 128, %s20_s20, [#allocation5]  }
  0x1d   :  { %149 = dma.done.wait [#allocation5], 128  }
  0x1e   :  { %150 = vsyncadd [#allocation5], 4294967168  ;;  %s88_s30 = sld [smem:[#allocation3 + $0x8]]  ;;  %s89_s3 = sld [smem:[#allocation3 + $0x9]]  ;;  %v26_v0 = vld [vmem:[#allocation4] sm:$0x7f] }
  0x1f   :  { %s87_s4 = sld [smem:[#allocation3 + $0x7]]  ;;  %s86_s5 = sld [smem:[#allocation3 + $0x6]] }
  0x20   :  { %s85_s6 = sld [smem:[#allocation3 + $0x5]]  ;;  %s84_s7 = sld [smem:[#allocation3 + $0x4]] }
  0x21   :  { %s83_s1 = sld [smem:[#allocation3 + $0x3]]  ;;  %s82_s8 = sld [smem:[#allocation3 + $0x2]] }
  0x22   :  { %s81_s9 = sld [smem:[#allocation3 + $0x1]]  ;;  %s27_s10 = sld [smem:[#allocation3]] }
  0x23   :  { %s155_s11 = smov [#allocation7]  }
  0x24   :  { %v37_v1 = vstv %s89_s3  ;;  %v39_v2 = vstv %s88_s30  ;;  %s72_s12 = sshll.u32 %s155_s11, 4  ;;  %s73_s12 = int_to_ptr.vmem [resolvable:$true] %s72_s12 }
  0x25   :  { %v38_v3 = vmul.f32 %v37_v1, %v26_v0  ;;  %v42_v5 = vstv %s87_s4  ;;  %v45_v8 = vstv %s86_s5  ;;  %s125_s13 = scalar_lea.vmem %s73_s12, 128  ;;  %p130_p12 = scmp.lt.s32.totalorder %s73_s12, %s73_s12 }
  0x26   :  { %v48_v11 = vstv %s85_s6  ;;  %v51_v14 = vstv %s84_s7  ;;  %p126_p11 = scmp.ne.s32.totalorder %s73_s12, %s125_s13  ;;  %p131_p13 = scmp.lt.s32.totalorder %s125_s13, %s125_s13 }
  0x27   :  { %v40_v4 = vadd.f32 %v39_v2, %v38_v3  ;;  %v54_v17 = vstv %s83_s1  ;;  %v57_v20 = vstv %s82_s8 }
  0x28   :  { %v60_v23 = vstv %s81_s9  ;;  %v63_v26 = vstv %s27_s10  ;;  %p132_p0 = por %p131_p13, %p130_p12 }
  0x29   :  { %v41_v6 = vmul.f32 %v40_v4, %v26_v0 }
  0x2a   :  { %p133_p1 = pnand %p132_p0, %p126_p11 }
  0x2b   :  { %v43_v7 = vadd.f32 %v42_v5, %v41_v6 }
  0x2d   :  { %v44_v9 = vmul.f32 %v43_v7, %v26_v0 }
  0x2f   :  { %v46_v10 = vadd.f32 %v45_v8, %v44_v9 }
  0x31   :  { %v47_v12 = vmul.f32 %v46_v10, %v26_v0 }
  0x33   :  { %v49_v13 = vadd.f32 %v48_v11, %v47_v12 }
  0x35   :  { %v50_v15 = vmul.f32 %v49_v13, %v26_v0 }
  0x37   :  { %v52_v16 = vadd.f32 %v51_v14, %v50_v15 }
  0x39   :  { %v53_v18 = vmul.f32 %v52_v16, %v26_v0 }
  0x3b   :  { %v55_v19 = vadd.f32 %v54_v17, %v53_v18 }
  0x3d   :  { %v56_v21 = vmul.f32 %v55_v19, %v26_v0 }
  0x3f   :  { %v58_v22 = vadd.f32 %v57_v20, %v56_v21 }
  0x41   :  { %v59_v24 = vmul.f32 %v58_v22, %v26_v0 }
  0x43   :  { %v61_v25 = vadd.f32 %v60_v23, %v59_v24 }
  0x45   :  { %v62_v27 = vmul.f32 %v61_v25, %v26_v0 }
  0x47   :  { %v64_v28 = vadd.f32 %v63_v26, %v62_v27 }
  0x49   :  { %65 = vst [vmem:[#allocation7] sm:$0x7f] %v64_v28 }
  0x4a   :  { %136 = shalt.err (!%p133_p1)
}
  0x4b   :  { %s137_s16 = scalar_lea.hbm %s209_s2, 128 }
  0x4c   :  { %p138_p2 = scmp.ne.s32.totalorder %s209_s2, %s137_s16  ;;  %p141_p3 = scmp.lt.u32.totalorder %s137_s16, %s209_s2 }
  0x4e   :  { %p143_p4 = pnand %p141_p3, %p138_p2 }
  0x50   :  { %146 = shalt.err (!%p143_p4)
}
  0x51   :  { %75 = dma.vmem_to_hbm [thread:$0]  %s73_s12, 128, %s209_s2, [#allocation6]  }
  0x52   :  { %151 = dma.done.wait [#allocation6], 128  }
  0x53   :  { %152 = vsyncadd [#allocation6], 4294967168 }
  0x54   :  { %79 = vsyncpa [#allocation5], 1 }
  0x55   :  { %80 = vsyncpa [#allocation6], 1 }

</bundles_post_ra>
